<compile_context>
chip_gen: v5e
topology: v5e:2x2
jax: 0.10.0
libtpu: 0.0.40
codegen_flags: <defaults>
</compile_context>

<pallas_src>
import functools
import math

import jax
import jax.numpy as jnp
from jax.experimental import pallas as pl
from jax.experimental.pallas import tpu as pltpu

_LANES = 128


# ---------------------------------------------------------------------------
# Kernel
# ---------------------------------------------------------------------------

def _cmp_spike_kernel(x_ref, out_ref, *, cutoff, flip):
    """spike = (x >= cutoff)  (or x <= cutoff when tau < 0).  cutoff is a baked constant."""
    x = x_ref[...].astype(jnp.float32)
    spike = (x <= cutoff) if flip else (x >= cutoff)
    out_ref[...] = spike.astype(out_ref.dtype)


def _xla_spike(x_f32, cutoff, flip, out_dtype):
    """Same compare in plain XLA (small-input bypass / ragged tail / tau == 0 helper)."""
    spike = (x_f32 <= cutoff) if flip else (x_f32 >= cutoff)
    return spike.astype(out_dtype)


# ---------------------------------------------------------------------------
# Wrapper
# ---------------------------------------------------------------------------

def multi_step_eif_forward(x, threshold=1.0, rest_potential=0.0, tau=1.0,
                           delta_T=1.0, theta_rh=0.8, *,
                           tile_rows=8192, out_dtype=jnp.float32,
                           min_pallas_elems=1 << 19):
    """EIF spiking forward pass. x: float array, any shape (e.g. NCHW). Returns spikes."""
    threshold = float(threshold)
    rest_potential = float(rest_potential)
    tau = float(tau)
    delta_T = float(delta_T)
    theta_rh = float(theta_rh)

    orig_shape = x.shape
    # Pallas TPU has no f64; keep f32/bf16/f16 as-is, cast everything else to f32.
    if x.dtype not in (jnp.float32, jnp.bfloat16, jnp.float16):
        x = x.astype(jnp.float32)

    # --- Hoisted scalar math: exp / divide never enter the kernel -----------------
    # NOTE: delta_T == 0 divides by zero on host, same hazard as the reference.
    exp_term = delta_T * math.exp((0.0 - theta_rh) / delta_T)

    if tau == 0.0:
        # Degenerate case: the PyTorch reference propagates inf/nan. Mirror it in XLA.
        mem = (1.0 / jnp.float32(tau)) * (x.astype(jnp.float32) + rest_potential + exp_term)
        return (mem >= threshold).astype(out_dtype).reshape(orig_shape)

    # mem >= threshold  <=>  x  >=  threshold*tau - rest - exp_term   (tau > 0)
    #                   <=>  x  <=  threshold*tau - rest - exp_term   (tau < 0)
    cutoff = threshold * tau - rest_potential - exp_term
    flip = tau < 0.0

    n = x.size
    if n == 0:
        return jnp.zeros(orig_shape, out_dtype)
    if n < min_pallas_elems:
        # Small-input bypass: Pallas dispatch overhead dominates tiny activations.
        return _xla_spike(x.astype(jnp.float32), cutoff, flip, out_dtype).reshape(orig_shape)

    # --- Lane-dense (rows, 128) slab; ragged tail handled in XLA (no pad/slice) ---
    x_flat = x.reshape(-1)
    rows = n // _LANES
    rem = n - rows * _LANES

    tail_out = None
    if rem:
        tail_out = _xla_spike(x_flat[rows * _LANES:].astype(jnp.float32),
                              cutoff, flip, out_dtype)
        x_flat = x_flat[:rows * _LANES]

    if rows == 0:
        out_flat = tail_out
    else:
        x2d = x_flat.reshape(rows, _LANES)

        # Sublane packing per input dtype: f32 -> 8, bf16/f16 -> 16, 1-byte -> 32.
        packing = max(8, 32 // jnp.dtype(x2d.dtype).itemsize)
        tile_rows = max(packing, -(-int(tile_rows) // packing) * packing)

        if rows > tile_rows:
            tr = tile_rows
        elif rows >= 2 * packing:
            # Guarantee >= 2 grid programs so ("parallel",) can use both v7x TensorCores.
            half = (rows + 1) // 2
            tr = min(rows, ((half + packing - 1) // packing) * packing)
        else:
            tr = rows                      # equals the full dim: always a legal block
        grid = (pl.cdiv(rows, tr),)

        kernel = functools.partial(_cmp_spike_kernel, cutoff=cutoff, flip=flip)
        bytes_io = rows * _LANES * (x2d.dtype.itemsize + jnp.dtype(out_dtype).itemsize)

        out2d = pl.pallas_call(
            kernel,
            out_shape=jax.ShapeDtypeStruct((rows, _LANES), out_dtype),
            grid=grid,
            in_specs=[pl.BlockSpec((tr, _LANES), lambda i: (i, 0))],
            out_specs=pl.BlockSpec((tr, _LANES), lambda i: (i, 0)),
            compiler_params=pltpu.CompilerParams(
                dimension_semantics=("parallel",),
                vmem_limit_bytes=48 * 1024 * 1024,
            ),
            cost_estimate=pl.CostEstimate(
                flops=rows * _LANES, transcendentals=0, bytes_accessed=bytes_io),
        )(x2d)

        out_flat = out2d.reshape(-1)
        if tail_out is not None:
            out_flat = jnp.concatenate([out_flat, tail_out])

    return out_flat.reshape(orig_shape)


# ---------------------------------------------------------------------------
# Reference + self-test
# ---------------------------------------------------------------------------

def _reference(x, threshold=1.0, rest_potential=0.0, tau=1.0, delta_T=1.0, theta_rh=0.8):
    """Faithful transcription of the PyTorch forward (mem starts at zeros)."""
    mem = jnp.zeros(x.shape, jnp.float32)
    mem = mem + 1.0 / tau * (x.astype(jnp.float32) - (mem - rest_potential)
                             + delta_T * jnp.exp((mem - theta_rh) / delta_T))
    spike = (mem >= threshold).astype(jnp.float32)
    return mem, spike


def _check(x, **kw):
    mod_keys = ("threshold", "rest_potential", "tau", "delta_T", "theta_rh")
    mod_params = {k: kw[k] for k in mod_keys if k in kw}
    out = jax.block_until_ready(multi_step_eif_forward(x, **kw))
    mem, ref = _reference(x, **mod_params)
    thr = float(mod_params.get("threshold", 1.0))
    assert out.shape == x.shape and out.dtype == jnp.float32
    # Precomputed cutoff reorders float math; tolerate disagreement only for elements
    # sitting (numerically) exactly on the threshold boundary.
    mismatch = out != ref
    ok = bool(jnp.all(jnp.logical_or(~mismatch, jnp.abs(mem - thr) < 1e-5)))
    assert ok, "mismatch vs reference"


if __name__ == "__main__":
    key = jax.random.PRNGKey(0)
    k0, k1, k2, k3, k4 = jax.random.split(key, 5)

    # NCHW input, same convention as the PyTorch module; force the Pallas path.
    x = jax.random.normal(k0, (2, 4, 16, 16), dtype=jnp.float32)
    _check(x, min_pallas_elems=0)

    # Same input via the small-input XLA bypass (default threshold).
    _check(x)

    # Multi-block grid + partial last block: 40 rows of 128 lanes, 16-row tiles.
    x_ragged = jax.random.normal(k1, (5, 8, 128), dtype=jnp.float32)
    _check(x_ragged, tile_rows=16, min_pallas_elems=0)

    # Element count not a multiple of 128: kernel prefix + XLA tail.
    x_odd = jax.random.normal(k2, (3, 7, 19), dtype=jnp.float32)
    _check(x_odd, min_pallas_elems=0)

    # Fewer than 128 elements total (rows == 0): pure tail path.
    x_tiny = jax.random.normal(k3, (3, 5, 7), dtype=jnp.float32)
    _check(x_tiny, min_pallas_elems=0)

    # Negative tau exercises the flipped-inequality single-compare path.
    x_neg = jax.random.normal(k4, (4, 8, 32), dtype=jnp.float32)
    _check(x_neg, tau=-2.0, min_pallas_elems=0)

    print("KERNEL_OK")
</pallas_src>

<mosaic_0001>
module attributes {stable_mosaic.version = 11 : i64} {
  func.func @_cmp_spike_kernel(%arg0: i32, %arg1: memref<8x128xf32, #tpu.memory_space<vmem>>, %arg2: memref<8x128xf32, #tpu.memory_space<vmem>>) attributes {dimension_semantics = [#tpu.dimension_semantics<parallel>], iteration_bounds = array<i64: 2>, scalar_prefetch = 0 : i64, scratch_operands = 0 : i64, tpu.core_type = #tpu.core_type<tc>, window_params = [{transform_indices = @transform_0, window_bounds = array<i64: 8, 128>}, {transform_indices = @transform_1, window_bounds = array<i64: 8, 128>}]} {
    %c0 = arith.constant 0 : index
    %c0_0 = arith.constant 0 : index
    %0 = vector.load %arg1[%c0, %c0_0] : memref<8x128xf32, #tpu.memory_space<vmem>>, vector<8x128xf32>
    %cst = arith.constant 0.550671041 : f32
    %1 = vector.broadcast %cst : f32 to vector<8x128xf32>
    %2 = arith.cmpf oge, %0, %1 : vector<8x128xf32>
    %3 = arith.extui %2 : vector<8x128xi1> to vector<8x128xi32>
    %4 = arith.sitofp %3 : vector<8x128xi32> to vector<8x128xf32>
    %c0_1 = arith.constant 0 : index
    %c0_2 = arith.constant 0 : index
    %5 = vector.load %arg2[%c0_1, %c0_2] : memref<8x128xf32, #tpu.memory_space<vmem>>, vector<8x128xf32>
    tpu.vector_store %arg2[%c0_1, %c0_2], %4 {strides = array<i32>} : memref<8x128xf32, #tpu.memory_space<vmem>>, vector<8x128xf32>,
    return
  }
  func.func @transform_0(%arg0: i32) -> (i32, i32) {
    %c0_i32 = arith.constant 0 : i32
    %c0_i32_0 = arith.constant 0 : i32
    return %arg0, %c0_i32 : i32, i32
  }
  func.func @transform_1(%arg0: i32) -> (i32, i32) {
    %c0_i32 = arith.constant 0 : i32
    %c0_i32_0 = arith.constant 0 : i32
    return %arg0, %c0_i32 : i32, i32
  }
}

</mosaic_0001>

<bundles_post_ra>
// kernel: tpu_custom_call.1
= control target key start
LH: loop header
LB: loop body
LE: loop exit
PB: predicated region body
PF: predicated region fallthrough
CT: control target
= control target key end

     0   :  { %6 = vsyncpa [#allocation3], 0  ;;  %s521_s0 = inlined_call_operand.hbm [shape: f32[16,128], index: 0, kind: input, shape index: {}]   ;;  %s522_s1 = inlined_call_operand.hbm [shape: f32[16,128], index: 1, kind: output, shape index: {}]  }
   0x1   :  { %8 = vsyncpa [#allocation3 + $0x1], 0 }
   0x2   :  { %9 = vsyncpa [#allocation4], 0 }
   0x3   :  { %11 = vsyncpa [#allocation4 + $0x1], 0  ;;  %s394_s6 = smov 0   ;;  %s396_s7 = smov 0  }
   0x4   :  { %s398_s8 = smov 0   ;;  %s400_s9 = smov 0  }
   0x5 LB: > { %s415_s10 = sadd.s32 4294967295, %s381_s9   ;;  %s225_s11 = sadd.s32 4294967294, %s381_s9   ;;  %s381_s9 = sphi %s400_s9, %s532_s9   ;;  %s377_s8 = sphi %s398_s8, %s531_s8   ;;  %s373_s7 = sphi %s396_s7, %s530_s7   ;;  %s369_s6 = sphi %s394_s6, %s529_s6  }
   0x6   : > { %s419_s12 = sadd.s32 1, %s381_s9   ;;  %s24_s13 = sadd.s32 1, %s377_s8 }
   0x7   : > { %s21_s14 = ssub.s32 %s381_s9, %s419_s12  ;;  %p31_p0 = scmp.ne.s32.totalorder %s377_s8, %s373_s7 }
   0x8   : > { %p22_p1 = scmp.eq.s32.totalorder %s21_s14, 0  ;;  %p32_p2 = scmp.eq.s32.totalorder %s381_s9, 0 }
   0x9   : > { %p37_p3 = scmp.ne.s32.totalorder %s373_s7, %s369_s6  ;;  %p38_p4 = scmp.eq.s32.totalorder %s415_s10, 0 }
   0xa   : > { %s431_s15 = scalar_select %p22_p1, %s377_s8, %s24_s13  }
   0xb   : > { %p433_p5 = por %p32_p2, %p31_p0  ;;  %p437_p6 = por %p38_p4, %p37_p3 }
   0xc   : > { %p61_p7 = scmp.eq.s32.totalorder %s415_s10, 1  ;;  %p67_p8 = scmp.eq.s32.totalorder %s225_s11, 1 }
   0xd   : > { %p250_p10 = scmp.lt.s32.totalorder %s381_s9, 2  ;;  %s87_s20 = sand.u32 1, %s377_s8  }
   0xe   : > { %p444_p11 = por %p61_p7, %p31_p0  ;;  %p448_p12 = por %p67_p8, %p37_p3 }
   0xf   : > { %s229_s21 = sshll.u32 %s381_s9, 3  ;;  %s228_s22 = sshll.u32 %s87_s20, 3 }
  0x10   : > { %s95_s25 = scalar_lea.hbm %s521_s0, %s229_s21  ;;  %s91_s27 = scalar_lea.vmem [#allocation2], %s228_s22 }
  0x11   : > { %s97_s26 = sshll.u32 %s95_s25, 4  ;;  %s99_s28 = sshll.u32 %s91_s27, 4  ;;  %s98_s26 = int_to_ptr.hbm [resolvable:$true] %s97_s26  ;;  %s100_s28 = int_to_ptr.vmem [resolvable:$true] %s99_s28 }
  0x12   : > { %p459_p13 = pnand %p250_p10, %p433_p5  ;;  %p230_p0 = scmp.ge.s32.totalorder %s381_s9, 1 }
  0x13   : > { %p104_p1 = scmp.lt.s32.totalorder %s381_s9, 3  ;;  %s88_s30 = scalar_lea.sflag [#allocation3], %s87_s20 }
  0x14   : > { %s285_s2 = sshra.s32 %s98_s26, 4  ;;  %p289_p3 = pneg %p459_p13  ;;  %s286_s2 = int_to_ptr.hbm [resolvable:$true] %s285_s2 }
  0x15   : > { %s287_s3 = scalar_lea.hbm %s286_s2, 8  ;;  %s292_s11 = scalar_lea.hbm %s521_s0, 16 }
  0x16   : > { %p288_p2 = scmp.ne.s32.totalorder %s286_s2, %s287_s3  ;;  %p293_p5 = scmp.lt.s32.totalorder %s286_s2, %s521_s0 }
  0x17   : > { %p294_p8 = scmp.lt.s32.totalorder %s292_s11, %s287_s3 }
  0x18   : > { %p290_p4 = pnand %p289_p3, %p288_p2 }
  0x19   : > { %p295_p10 = por %p294_p8, %p293_p5 }
  0x1a   : > { %p291_p7 = pneg %p290_p4 }
  0x1c   : > { %p296_p9 = pnand %p295_p10, %p291_p7 }
  0x1e   : > { %299 = shalt.err (!%p296_p9)
}
  0x1f   : > { %245 = dma.hbm_to_vmem [thread:$0]  (!%p459_p13), %s98_s26, 128, %s100_s28, %s88_s30  }
  0x20   : > { %p105_p2 = pnand %p230_p0, %p104_p1 }
  0x21   : > { %s480_s16 = sand.u32 (!%p105_p2), 1, %s373_s7  }
  0x22   : > { %108 = sbr.rel (%p105_p2) target bundleno = 55 (0x37), region = 24  ;;  %s231_s20 = sshll.u32 (!%p105_p2), %s480_s16, 3 }
  0x23   : > { %s111_s21 = scalar_lea.sflag (!%p105_p2), [#allocation3], %s480_s16  ;;  %s114_s22 = scalar_lea.vmem (!%p105_p2), [#allocation2], %s231_s20 }
  0x27   : > { %360 = dma.done.wait (%p437_p6), %s111_s21, 128  }
  0x28   : > { %362 = vsyncadd (%p437_p6), %s111_s21, 4294967168  ;;  %s235_s23 = sshll.u32 %s415_s10, 3  ;;  %s133_s27 = scalar_lea.vmem [#allocation5], %s231_s20  ;;  %v134_v0 = vld [vmem:[%s114_s22] sm:$0xff]  ;;  %v383_v1 = vmov 0.0  }
  0x29   : > { %s150_s26 = scalar_lea.hbm %s522_s1, %s235_s23  ;;  %s152_s28 = sshll.u32 %s133_s27, 4  ;;  %vm135_vm0 = vcmp.ge.f32.partialorder %v134_v0, 0.55067104  ;;  %s153_s28 = int_to_ptr.vmem [resolvable:$true] %s152_s28 }
  0x2a   : > { %s154_s29 = sshll.u32 %s150_s26, 4  ;;  %v233_v2 = vsel %vm135_vm0, 1.0, %v383_v1  ;;  %s140_s17 = scalar_lea.sflag [#allocation4], %s480_s16  ;;  %s155_s29 = int_to_ptr.hbm [resolvable:$true] %s154_s29 }
  0x2b   : > { %138 = vst [vmem:[%s133_s27] sm:$0xff] %v233_v2  ;;  %s329_s30 = sshra.s32 %s155_s29, 4  ;;  %s335_s4 = scalar_lea.hbm %s522_s1, 16  ;;  %s330_s30 = int_to_ptr.hbm [resolvable:$true] %s329_s30 }
  0x2c   : > { %s331_s2 = scalar_lea.hbm %s330_s30, 8  ;;  %p336_p0 = scmp.lt.s32.totalorder %s330_s30, %s522_s1 }
  0x2d   : > { %p332_p6 = scmp.ne.s32.totalorder %s330_s30, %s331_s2  ;;  %p337_p1 = scmp.lt.s32.totalorder %s335_s4, %s331_s2 }
  0x2f   : > { %p333_p9 = pnand %p332_p6, %p444_p11  ;;  %p338_p3 = por %p337_p1, %p336_p0 }
  0x31   : > { %p334_p13 = pneg %p333_p9 }
  0x33   : > { %p339_p4 = pnand %p338_p3, %p334_p13 }
  0x35   : > { %342 = shalt.err (!%p339_p4)
}
  0x36   : > { %240 = dma.vmem_to_hbm [thread:$0]  (%p444_p11), %s153_s28, 128, %s155_s29, %s140_s17  }
  0x37 PF: > { %s166_s13 = sand.u32 1, %s369_s6   ;;  %p528_p7 = scmp.ge.s32.totalorder %s381_s9, 2 }
  0x38   : > { %s167_s14 = scalar_lea.sflag [#allocation4], %s166_s13 }
  0x39   : > { %p247_p5 = pnand %p528_p7, %p448_p12 }
  0x3b   : > { %p248_p8 = pneg %p247_p5 }
  0x3d   : > { %364 = dma.done.wait (%p248_p8), %s167_s14, 128  }
  0x3e   : > { %366 = vsyncadd (%p248_p8), %s167_s14, 4294967168  ;;  %p14_p10 = scmp.ge.s32.totalorder %s419_s12, 4   ;;  %s529_s6 = smov %s373_s7 }
  0x3f   : > { %s530_s7 = smov %s377_s8  ;;  %s531_s8 = smov %s431_s15 }
  0x40   : > { %s532_s9 = smov %s419_s12  ;;  %16 = sbr.rel (!%p14_p10) target bundleno = 5 (0x5), region = 69 }
  0x45   :  { %173 = vsyncpa [#allocation3], 1 }
  0x46   :  { %175 = vsyncpa [#allocation3 + $0x1], 1 }
  0x47   :  { %176 = vsyncpa [#allocation4], 1 }
  0x48   :  { %178 = vsyncpa [#allocation4 + $0x1], 1 }

</bundles_post_ra>
